<compile_context>
chip_gen: v7x
topology: tpu7x:2x2x1
jax: 0.10.0
libtpu: 0.0.40
codegen_flags: <defaults>
</compile_context>

<pallas_src>
import functools
import math

import jax
import jax.numpy as jnp
from jax.experimental import pallas as pl
from jax.experimental.pallas import tpu as pltpu

DIM = 256
HEADS = 8
HEAD_DIM = DIM // HEADS
FFN = 4 * DIM
NEG_INF = -1e30


# --------------------------------------------------------------------------
# small helpers
# --------------------------------------------------------------------------
def _fs(shape):
    """Full-array BlockSpec for a grid=(1,) pallas_call (no (8,128) divisibility issues)."""
    nd = len(shape)
    return pl.BlockSpec(shape, lambda *_, nd=nd: (0,) * nd)


def _dot(a, b):
    return jnp.dot(a, b, preferred_element_type=jnp.float32)


def _dot_t(a, b):  # a [m, k], b [n, k] -> [m, n] (contract last dims, no transpose op)
    return jax.lax.dot_general(a, b, (((1,), (1,)), ((), ())),
                               preferred_element_type=jnp.float32)


def _layernorm(x, g, b, eps=1e-5):
    mu = jnp.mean(x, axis=-1, keepdims=True)
    xc = x - mu
    var = jnp.mean(xc * xc, axis=-1, keepdims=True)
    return xc * jax.lax.rsqrt(var + eps) * g + b


def _gelu_tanh(x):
    # TODO(synk): torch nn.GELU() default uses exact erf; tanh approximation used
    # (|err| < ~3e-3) since erf has no clean Mosaic lowering here.
    c = 0.7978845608028654  # sqrt(2/pi)
    return 0.5 * x * (1.0 + jnp.tanh(c * (x + 0.044715 * x * x * x)))


def _elu(x):
    return jnp.where(x > 0.0, x, jnp.exp(jnp.minimum(x, 0.0)) - 1.0)


# --------------------------------------------------------------------------
# Kernel 1: plain linear  y = x @ W + b   (bf16 weights, f32 accum) -- embedmap
# --------------------------------------------------------------------------
def _linear_kernel(x_ref, w_ref, b_ref, o_ref):
    x = x_ref[...].astype(jnp.bfloat16)
    o_ref[...] = _dot(x, w_ref[...]) + b_ref[...]


def linear(x, w, b):
    """x: [R, In] (any float), w: [In, Out] bf16, b: [1, Out] f32 -> [R, Out] f32."""
    R, In = x.shape
    Out = w.shape[1]
    return pl.pallas_call(
        _linear_kernel,
        out_shape=jax.ShapeDtypeStruct((R, Out), jnp.float32),
        grid=(1,),
        in_specs=[_fs((R, In)), _fs((In, Out)), _fs((1, Out))],
        out_specs=_fs((R, Out)),
    )(x.astype(jnp.float32), w, b)


# --------------------------------------------------------------------------
# Kernel 2: fused transformer block (MHA + LN + FFN + LN), whole batch folded into rows.
#   bias is an additive [Rq, Rk] key mask (0 / -1e30) that also blocks cross-batch keys.
# --------------------------------------------------------------------------
def _attn_block_kernel(xq_ref, xkv_ref, bias_ref, wqkv_ref, bqkv_ref, wo_ref, bo_ref,
                       ln_ref, wf1_ref, bf1_ref, wf2_ref, bf2_ref, o_ref,
                       *, add_residual):
    xq = xq_ref[...]                      # [Rq, D] f32
    xkv = xkv_ref[...]                    # [Rk, D] f32
    bias = bias_ref[...]                  # [Rq, Rk] f32

    xq_b = xq.astype(jnp.bfloat16)
    xkv_b = xkv.astype(jnp.bfloat16)
    wqkv = wqkv_ref[...]                  # [D, 3D] bf16
    bqkv = bqkv_ref[...]                  # [1, 3D] f32

    # Full-width (K=256) projections, f32 accumulation.
    q = _dot(xq_b, wqkv[:, 0:DIM]) + bqkv[:, 0:DIM]
    k = _dot(xkv_b, wqkv[:, DIM:2 * DIM]) + bqkv[:, DIM:2 * DIM]
    v = _dot(xkv_b, wqkv[:, 2 * DIM:3 * DIM]) + bqkv[:, 2 * DIM:3 * DIM]

    scale = 1.0 / math.sqrt(HEAD_DIM)
    heads = []
    for h in range(HEADS):                # tiny per-head score/PV matmuls, f32
        lo, hi = h * HEAD_DIM, (h + 1) * HEAD_DIM
        s = _dot_t(q[:, lo:hi], k[:, lo:hi]) * scale + bias   # [Rq, Rk]
        s = s - jnp.max(s, axis=-1, keepdims=True)
        e = jnp.exp(s)
        p = e / jnp.sum(e, axis=-1, keepdims=True)
        heads.append(_dot(p, v[:, lo:hi]))
    attn = jnp.concatenate(heads, axis=-1)                    # [Rq, D] f32
    attn = _dot(attn.astype(jnp.bfloat16), wo_ref[...]) + bo_ref[...]
    if add_residual:                      # SelfTransformer residual before norm_1
        attn = attn + xq

    ln = ln_ref[...]                      # [4, D] f32
    x1 = _layernorm(attn, ln[0:1, :], ln[1:2, :])
    hmid = _gelu_tanh(_dot(x1.astype(jnp.bfloat16), wf1_ref[...]) + bf1_ref[...])
    x2 = _dot(hmid.astype(jnp.bfloat16), wf2_ref[...]) + bf2_ref[...]
    o_ref[...] = _layernorm(x2 + x1, ln[2:3, :], ln[3:4, :])


def attention_block(xq, xkv, bias, tp, add_residual):
    """xq:[Rq,D] f32, xkv:[Rk,D] f32, bias:[Rq,Rk] f32 additive key mask."""
    Rq, D = xq.shape
    Rk = xkv.shape[0]
    wqkv, bqkv, wo, bo, ln, wf1, bf1, wf2, bf2 = tp
    kernel = functools.partial(_attn_block_kernel, add_residual=add_residual)
    return pl.pallas_call(
        kernel,
        out_shape=jax.ShapeDtypeStruct((Rq, D), jnp.float32),
        grid=(1,),
        in_specs=[
            _fs((Rq, D)), _fs((Rk, D)), _fs((Rq, Rk)),
            _fs((D, 3 * D)), _fs((1, 3 * D)),
            _fs((D, D)), _fs((1, D)),
            _fs((4, D)),
            _fs((D, FFN)), _fs((1, FFN)),
            _fs((FFN, D)), _fs((1, D)),
        ],
        out_specs=_fs((Rq, D)),
        compiler_params=pltpu.CompilerParams(dimension_semantics=("arbitrary",)),
    )(xq.astype(jnp.float32), xkv.astype(jnp.float32), bias,
      wqkv, bqkv, wo, bo, ln, wf1, bf1, wf2, bf2)


# --------------------------------------------------------------------------
# Kernel 3: fused FutureEncoder + max-over-time + softmax-weighted mode aggregation.
#   xy is fed t-major ([T*Rm, 2]) so max-over-T is done with static row slices
#   (no in-kernel reshape).  The 2->64 MLP runs on the VPU (two broadcast FMAs).
#   wagg is a host-built block-diagonal [Rn, Rn*M] matrix holding softmax(scores)/M,
#   so futures = wagg @ multi_futures in one MXU matmul.
# --------------------------------------------------------------------------
def _future_kernel(xy_ref, wagg_ref, w1_ref, b1_ref, w2_ref, b2_ref,
                   mf_ref, fut_ref, *, T, Rm):
    xy = xy_ref[...]                      # [T*Rm, 2] f32
    w1 = w1_ref[...]                      # [2, 64]   f32
    # 2 -> 64 on the VPU: h = relu(x0*w1[0] + x1*w1[1] + b1)
    h = xy[:, 0:1] * w1[0:1, :] + xy[:, 1:2] * w1[1:2, :] + b1_ref[...]
    h = jnp.maximum(h, 0.0)               # [T*Rm, 64]
    traj = _dot(h.astype(jnp.bfloat16), w2_ref[...]) + b2_ref[...]   # [T*Rm, 256] f32
    # max over the time axis (t-major static row slices)
    mf = traj[0:Rm, :]
    for t in range(1, T):
        mf = jnp.maximum(mf, traj[t * Rm:(t + 1) * Rm, :])
    mf_ref[...] = mf                      # multi_futures [Rm, 256]
    # futures = mean_m(softmax(score) * multi_futures)  (block-diag weights from host)
    fut_ref[...] = _dot(wagg_ref[...], mf)


def future_encoder_agg(xy_tmajor, wagg, fe, *, T, Rm, Rn):
    kernel = functools.partial(_future_kernel, T=T, Rm=Rm)
    return pl.pallas_call(
        kernel,
        out_shape=(jax.ShapeDtypeStruct((Rm, DIM), jnp.float32),
                   jax.ShapeDtypeStruct((Rn, DIM), jnp.float32)),
        grid=(1,),
        in_specs=[_fs((T * Rm, 2)), _fs((Rn, Rm)),
                  _fs((2, 64)), _fs((1, 64)),
                  _fs((64, DIM)), _fs((1, DIM))],
        out_specs=(_fs((Rm, DIM)), _fs((Rn, DIM))),
    )(xy_tmajor, wagg, fe["w1"], fe["b1"], fe["w2"], fe["b2"])


# --------------------------------------------------------------------------
# Kernel 4: fused GMM predictor (gaussian + score branches, single read of x).
# --------------------------------------------------------------------------
def _gmm_kernel(x_ref, gw1_ref, gb1_ref, gw2_ref, gb2_ref,
                sw1_ref, sb1_ref, sw2_ref, sb2_ref, traj_ref, score_ref):
    x = x_ref[...].astype(jnp.bfloat16)                     # [R, 256]
    g = _elu(_dot(x, gw1_ref[...]) + gb1_ref[...])          # [R, 512] f32
    traj_ref[...] = _dot(g.astype(jnp.bfloat16), gw2_ref[...]) + gb2_ref[...]
    s = _elu(_dot(x, sw1_ref[...]) + sb1_ref[...])          # [R, 64] f32
    score_ref[...] = _dot(s, sw2_ref[...]) + sb2_ref[...]   # [R, 1] (f32 matvec)


def gmm_predictor(x, p, future_len):
    R = x.shape[0]
    return pl.pallas_call(
        _gmm_kernel,
        out_shape=(jax.ShapeDtypeStruct((R, future_len * 4), jnp.float32),
                   jax.ShapeDtypeStruct((R, 1), jnp.float32)),
        grid=(1,),
        in_specs=[_fs((R, DIM)),
                  _fs((DIM, 512)), _fs((1, 512)),
                  _fs((512, future_len * 4)), _fs((1, future_len * 4)),
                  _fs((DIM, 64)), _fs((1, 64)),
                  _fs((64, 1)), _fs((1, 1))],
        out_specs=(_fs((R, future_len * 4)), _fs((R, 1))),
    )(x, p["gw1"], p["gb1"], p["gw2"], p["gb2"],
      p["sw1"], p["sb1"], p["sw2"], p["sb2"])


# --------------------------------------------------------------------------
# Host-side glue
# --------------------------------------------------------------------------
def build_bias(B, q_per, key_pad):
    """Additive attention bias [B*q_per, B*Lk]: -1e30 for padded or cross-batch keys."""
    Lk = key_pad.shape[1]
    eye = jnp.eye(B, dtype=jnp.bool_)                               # [Bq, Bk]
    valid = eye[:, :, None] & (~key_pad)[None, :, :]                # [Bq, Bk, Lk]
    valid = jnp.broadcast_to(valid[:, None, :, :], (B, q_per, B, Lk))
    return jnp.where(valid, 0.0, NEG_INF).astype(jnp.float32).reshape(B * q_per, B * Lk)


def split_and_pad(x, counts, pad_to):
    # emulation of torch.nested.nested_tensor(tensor_split(...)).to_padded_tensor(0)
    B = len(counts)
    out = jnp.zeros((B, pad_to) + x.shape[1:], jnp.float32)
    start = 0
    for b, c in enumerate(counts):
        out = out.at[b, :c].set(x[start:start + c])
        start += c
    return out


def initial_decoder_fwd(idx, encodings, mask, p, modalities):
    B, Npad, D = encodings.shape
    mmq = p["modal_emb"]                               # [modalities, D]
    aq = p["agent_emb"][idx]                           # [D]
    mmaq = mmq + aq[None, :]                           # [modalities, D]
    query = (encodings[:, :, None, :] + mmaq[None, None, :, :]).reshape(B * Npad * modalities, D)
    keys = encodings.reshape(B * Npad, D)
    bias = build_bias(B, Npad * modalities, mask)
    qc = attention_block(query, keys, bias, p["query_encoder"], add_residual=False)
    return qc.reshape(B, Npad, modalities, D)


def interaction_decoder_fwd(idx, actors, scores, last_content, encodings, mask, p, fe, future_len):
    B, N, M, T, _ = actors.shape
    Rm, Rn = B * N * M, B * N

    # t-major xy layout so the fused kernel can max over time with static row slices
    xy = jnp.transpose(actors[..., :2].reshape(Rm, T, 2), (1, 0, 2)).reshape(T * Rm, 2)
    xy = xy.astype(jnp.float32)

    # softmax(score)/M folded into a block-diagonal [Rn, Rn*M] aggregation matrix
    w = jax.nn.softmax(scores.reshape(Rn, M).astype(jnp.float32), axis=-1) / M
    wagg = (jnp.eye(Rn, dtype=jnp.float32)[:, :, None] * w[None, :, :]).reshape(Rn, Rn * M)

    multi_futures, futures = future_encoder_agg(xy, wagg, fe, T=T, Rm=Rm, Rn=Rn)

    # self attention over per-agent futures (residual variant)
    bias_self = build_bias(B, N, mask)
    interaction = attention_block(futures, futures, bias_self,
                                  p["interaction_encoder"], add_residual=True)
    interaction = interaction.reshape(B, N, DIM)

    enc_cat = jnp.concatenate([interaction, encodings], axis=1)          # [B, 2N, D]
    mask_cat = jnp.concatenate([mask[:, :N], mask], axis=1)
    mask_cat = mask_cat.at[:, idx].set(True)

    query = last_content.reshape(Rm, DIM) + multi_futures                # [Rm, D]
    bias_cross = build_bias(B, N * M, mask_cat)
    qc = attention_block(query, enc_cat.reshape(B * 2 * N, DIM), bias_cross,
                         p["query_encoder"], add_residual=False)

    traj, score = gmm_predictor(qc, p["decoder"], future_len)
    qc = qc.reshape(B, N, M, DIM)
    traj = traj.reshape(B, N, M, future_len, 4)
    score = score.reshape(B, N, M)
    return qc, traj, score


def decoder_forward(encoder_inputs, params, *, modalities, future_len, levels):
    loc = encoder_inputs["pred"]["loc_propose_pos"]   # [total, M, T, 2]
    pi = encoder_inputs["pred"]["pi"]                 # [total, M]
    enc_raw = encoder_inputs["encodings"]             # [total, 6*128]
    ptr = encoder_inputs["ptr"]                       # cumulative counts, static ints
    counts = [int(ptr[0])] + [int(ptr[i] - ptr[i - 1]) for i in range(1, len(ptr))]
    B = len(counts)
    N_pad = max(counts)

    # embedmap on the un-padded rows (padded rows stay exactly zero, as in torch)
    emb = linear(enc_raw, params["embedmap_w"], params["embedmap_b"])

    encodings = split_and_pad(emb, counts, N_pad)          # [B, Npad, 256]
    last_level = split_and_pad(loc, counts, N_pad)         # [B, Npad, M, T, 2]
    last_scores = split_and_pad(pi, counts, N_pad)         # [B, Npad, M]
    masks = jnp.arange(N_pad)[None, :] >= jnp.asarray(counts)[:, None]   # True = padded

    outputs = {}
    last_content = initial_decoder_fwd(0, encodings, masks, params["initial"], modalities)
    outputs["level_0_interactions"] = last_level
    outputs["level_0_scores"] = last_scores
    for k in range(1, levels + 1):
        lp = params["levels"][k - 1]
        last_content, last_level, last_scores = interaction_decoder_fwd(
            0, last_level, last_scores, last_content, encodings, masks,
            lp, params["future_encoder"], future_len)
        outputs[f"level_{k}_interactions"] = last_level
        outputs[f"level_{k}_scores"] = last_scores
    return outputs


# --------------------------------------------------------------------------
# Deterministic parameter initialization (shapes from the module __init__)
# --------------------------------------------------------------------------
def init_params(key, modalities, future_len, neighbors, levels):
    keys = iter(jax.random.split(key, 256))
    bf = jnp.bfloat16

    def nrm(shape, scale=0.02, dtype=jnp.float32):
        return (scale * jax.random.normal(next(keys), shape, dtype=jnp.float32)).astype(dtype)

    def transformer_params():
        ln = jnp.concatenate([jnp.ones((1, DIM)), jnp.zeros((1, DIM)),
                              jnp.ones((1, DIM)), jnp.zeros((1, DIM))], axis=0).astype(jnp.float32)
        return (nrm((DIM, 3 * DIM), dtype=bf), nrm((1, 3 * DIM)),
                nrm((DIM, DIM), dtype=bf), nrm((1, DIM)),
                ln,
                nrm((DIM, FFN), dtype=bf), nrm((1, FFN)),
                nrm((FFN, DIM), dtype=bf), nrm((1, DIM)))

    params = {
        "embedmap_w": nrm((6 * 128, DIM), dtype=bf),
        "embedmap_b": nrm((1, DIM)),
        "initial": {
            "modal_emb": nrm((modalities, DIM)),
            "agent_emb": nrm((neighbors + 1, DIM)),
            "query_encoder": transformer_params(),
        },
        # FutureEncoder is shared across all interaction levels (single instance).
        "future_encoder": {
            "w1": nrm((2, 64)), "b1": nrm((1, 64)),
            "w2": nrm((64, DIM), dtype=bf), "b2": nrm((1, DIM)),
        },
        "levels": [],
    }
    for _ in range(levels):
        params["levels"].append({
            "interaction_encoder": transformer_params(),
            "query_encoder": transformer_params(),
            "decoder": {
                "gw1": nrm((DIM, 512), dtype=bf), "gb1": nrm((1, 512)),
                "gw2": nrm((512, future_len * 4), dtype=bf), "gb2": nrm((1, future_len * 4)),
                "sw1": nrm((DIM, 64), dtype=bf), "sb1": nrm((1, 64)),
                "sw2": nrm((64, 1)), "sb2": nrm((1, 1)),
            },
        })
    return params


if __name__ == "__main__":
    modalities = 6        # M (prediction modes)
    future_len = 8        # T
    neighbors = 7         # neighbors_to_predict -> N_pad = 8 agents per scene
    levels = 2
    counts = [5, 8]       # agents per scene (batch of 2 scenes)
    total = sum(counts)

    key = jax.random.PRNGKey(0)
    k_loc, k_pi, k_enc, k_par = jax.random.split(key, 4)
    encoder_inputs = {
        "pred": {
            "loc_propose_pos": jax.random.normal(k_loc, (total, modalities, future_len, 2),
                                                 dtype=jnp.float32),
            "pi": jax.random.normal(k_pi, (total, modalities), dtype=jnp.float32),
        },
        "encodings": jax.random.normal(k_enc, (total, 6 * 128), dtype=jnp.float32),
        # ptr: cumulative agent counts (split points for tensor_split / padding)
        "ptr": [counts[0], counts[0] + counts[1]],
    }

    params = init_params(k_par, modalities, future_len, neighbors, levels)
    outputs = decoder_forward(encoder_inputs, params,
                              modalities=modalities, future_len=future_len, levels=levels)
    jax.block_until_ready(outputs)

    # sanity: expected output shapes
    assert outputs["level_0_interactions"].shape == (2, 8, modalities, future_len, 2)
    assert outputs[f"level_{levels}_interactions"].shape == (2, 8, modalities, future_len, 4)
    assert outputs[f"level_{levels}_scores"].shape == (2, 8, modalities)
    print("KERNEL_OK")
</pallas_src>

<mosaic_0001>
module attributes {stable_mosaic.version = 11 : i64} {
  func.func @_linear_kernel(%arg0: i32, %arg1: memref<13x768xf32, #tpu.memory_space<vmem>>, %arg2: memref<768x256xbf16, #tpu.memory_space<vmem>>, %arg3: memref<1x256xf32, #tpu.memory_space<vmem>>, %arg4: memref<13x256xf32, #tpu.memory_space<vmem>>) attributes {dimension_semantics = [#tpu.dimension_semantics<arbitrary>], iteration_bounds = array<i64: 1>, scalar_prefetch = 0 : i64, scratch_operands = 0 : i64, tpu.core_type = #tpu.core_type<tc>, window_params = [{pipeline_mode = #tpu.pipeline_mode<synchronous>, transform_indices = @transform_0, window_bounds = array<i64: 13, 768>}, {pipeline_mode = #tpu.pipeline_mode<synchronous>, transform_indices = @transform_1, window_bounds = array<i64: 768, 256>}, {pipeline_mode = #tpu.pipeline_mode<synchronous>, transform_indices = @transform_2, window_bounds = array<i64: 1, 256>}, {pipeline_mode = #tpu.pipeline_mode<synchronous>, transform_indices = @transform_3, window_bounds = array<i64: 13, 256>}]} {
    %c0 = arith.constant 0 : index
    %c0_0 = arith.constant 0 : index
    %0 = vector.load %arg1[%c0, %c0_0] : memref<13x768xf32, #tpu.memory_space<vmem>>, vector<13x768xf32>
    %1 = arith.truncf %0 : vector<13x768xf32> to vector<13x768xbf16>
    %c0_1 = arith.constant 0 : index
    %c0_2 = arith.constant 0 : index
    %2 = vector.load %arg2[%c0_1, %c0_2] : memref<768x256xbf16, #tpu.memory_space<vmem>>, vector<768x256xbf16>
    %cst = arith.constant dense<0.000000e+00> : vector<13x256xf32>
    %3 = tpu.matmul %1, %2, %cst {dimension_numbers = #tpu.dot_dimension_numbers<[1], [0], [0], [1], [0, 0, 1, 1], [], []>} : vector<13x768xbf16>, vector<768x256xbf16>, vector<13x256xf32> -> vector<13x256xf32>
    %c0_3 = arith.constant 0 : index
    %c0_4 = arith.constant 0 : index
    %4 = vector.load %arg3[%c0_3, %c0_4] : memref<1x256xf32, #tpu.memory_space<vmem>>, vector<1x256xf32>
    %5 = vector.broadcast %4 : vector<1x256xf32> to vector<13x256xf32>
    %6 = arith.addf %3, %5 : vector<13x256xf32>
    %c0_5 = arith.constant 0 : index
    %c0_6 = arith.constant 0 : index
    %7 = vector.load %arg4[%c0_5, %c0_6] : memref<13x256xf32, #tpu.memory_space<vmem>>, vector<13x256xf32>
    tpu.vector_store %arg4[%c0_5, %c0_6], %6 {strides = array<i32>} : memref<13x256xf32, #tpu.memory_space<vmem>>, vector<13x256xf32>,
    return
  }
  func.func @transform_0(%arg0: i32) -> (i32, i32) {
    %c0_i32 = arith.constant 0 : i32
    %c0_i32_0 = arith.constant 0 : i32
    %c0_i32_1 = arith.constant 0 : i32
    return %c0_i32, %c0_i32_0 : i32, i32
  }
  func.func @transform_1(%arg0: i32) -> (i32, i32) {
    %c0_i32 = arith.constant 0 : i32
    %c0_i32_0 = arith.constant 0 : i32
    %c0_i32_1 = arith.constant 0 : i32
    return %c0_i32, %c0_i32_0 : i32, i32
  }
  func.func @transform_2(%arg0: i32) -> (i32, i32) {
    %c0_i32 = arith.constant 0 : i32
    %c0_i32_0 = arith.constant 0 : i32
    %c0_i32_1 = arith.constant 0 : i32
    return %c0_i32, %c0_i32_0 : i32, i32
  }
  func.func @transform_3(%arg0: i32) -> (i32, i32) {
    %c0_i32 = arith.constant 0 : i32
    %c0_i32_0 = arith.constant 0 : i32
    %c0_i32_1 = arith.constant 0 : i32
    return %c0_i32, %c0_i32_0 : i32, i32
  }
}

</mosaic_0001>

<bundles_post_ra>
// kernel: tpu_custom_call.1
= control target key start
LH: loop header
LB: loop body
LE: loop exit
PB: predicated region body
PF: predicated region fallthrough
CT: control target
= control target key end

     0   :  { %8 = vsyncpa [#allocation3], 0  ;;  %s1201_s0 = inlined_call_operand.hbm [shape: f32[13,768], index: 0, kind: input, shape index: {}]   ;;  %s1202_s1 = inlined_call_operand.hbm [shape: bf16[768,256], index: 1, kind: input, shape index: {}]   ;;  %s1203_s2 = inlined_call_operand.vmem [shape: f32[1,256], index: 2, kind: input, shape index: {}]   ;;  %s1204_s3 = inlined_call_operand.hbm [shape: f32[13,256], index: 3, kind: output, shape index: {}]  }
   0x1   :  { %9 = vsyncpa [#allocation6], 0 }
   0x2   :  { %10 = vsyncpa [#allocation4], 0  ;;  %s1133_s12 = smov [#allocation2]   ;;  %s1061_s16 = scalar_lea.hbm %s1201_s0, 1536 }
   0x3   :  { %s16_s13 = sshll.u32 %s1133_s12, 4  ;;  %p1062_p0 = scmp.ne.s32.totalorder %s1201_s0, %s1061_s16  ;;  %s17_s13 = int_to_ptr.vmem [resolvable:$true] %s16_s13 }
   0x4   :  { %p1065_p1 = scmp.lt.u32.totalorder %s1061_s16, %s1201_s0 }
   0x6   :  { %p1067_p2 = pnand %p1065_p1, %p1062_p0 }
   0x8   :  { %1070 = shalt.err (!%p1067_p2)
}
   0x9   :  { %s1071_s21 = scalar_lea.vmem %s17_s13, 1536  ;;  %p1076_p4 = scmp.lt.s32.totalorder %s17_s13, %s17_s13 }
   0xa   :  { %p1072_p3 = scmp.ne.s32.totalorder %s17_s13, %s1071_s21  ;;  %p1077_p5 = scmp.lt.s32.totalorder %s1071_s21, %s1071_s21 }
   0xc   :  { %p1078_p6 = por %p1077_p5, %p1076_p4 }
   0xe   :  { %p1079_p7 = pnand %p1078_p6, %p1072_p3 }
  0x10   :  { %1082 = shalt.err (!%p1079_p7)
}
  0x11   :  { %s1134_s22 = smov 768   ;;  %s1135_s23 = smov 48  }
  0x12   :  { %22 = dma.hbm_to_vmem [thread:$0]  %s1201_s0, 1536, %s17_s13, [#allocation3], %s1134_s22, %s1134_s22, %s1135_s23  }
  0x13   :  { %s1136_s26 = smov [#allocation5]   ;;  %s1083_s30 = scalar_lea.hbm %s1202_s1, 12288 }
  0x14   :  { %s28_s27 = sshll.u32 %s1136_s26, 4  ;;  %p1084_p8 = scmp.ne.s32.totalorder %s1202_s1, %s1083_s30  ;;  %s29_s27 = int_to_ptr.vmem [resolvable:$true] %s28_s27 }
  0x15   :  { %p1087_p9 = scmp.lt.u32.totalorder %s1083_s30, %s1202_s1 }
  0x17   :  { %p1089_p10 = pnand %p1087_p9, %p1084_p8 }
  0x19   :  { %1092 = shalt.err (!%p1089_p10)
}
  0x1a   :  { %s1093_s8 = scalar_lea.vmem %s29_s27, 12288  ;;  %p1098_p12 = scmp.lt.s32.totalorder %s29_s27, %s29_s27 }
  0x1b   :  { %p1094_p11 = scmp.ne.s32.totalorder %s29_s27, %s1093_s8  ;;  %p1099_p13 = scmp.lt.s32.totalorder %s1093_s8, %s1093_s8 }
  0x1d   :  { %p1100_p0 = por %p1099_p13, %p1098_p12 }
  0x1f   :  { %p1101_p1 = pnand %p1100_p0, %p1094_p11 }
  0x21   :  { %1104 = shalt.err (!%p1101_p1)
}
  0x22   :  { %s1137_s0 = smov 128   ;;  %s1138_s9 = smov 8  }
  0x23   :  { %34 = dma.hbm_to_vmem [thread:$0]  %s1202_s1, 12288, %s29_s27, [#allocation6], %s1137_s0, %s1137_s0, %s1138_s9  }
  0x24   :  { %1127 = dma.done.wait [#allocation3], 1536  }
  0x25   :  { %1128 = vsyncadd [#allocation3], 4294965760 }
  0x26   :  { %1129 = dma.done.wait [#allocation6], 12288  }
  0x27   :  { %1130 = vsyncadd [#allocation6], 4294955008  ;;  %v917_v0 = vld [vmem:[#allocation5 + $0x104] ss:$8 sps:$4 sm:$0xff]   ;;  %v919_v1 = vld [vmem:[#allocation5 + $0x100] ss:$8 sps:$4 sm:$0xff]  }
  0x28   :  { %692 = vmatprep.subr.bf16.mxu0 %v917_v0  ;;  %v920_v2 = vld [vmem:[#allocation5 + $0x114] ss:$8 sps:$4 sm:$0xff]   ;;  %v922_v3 = vld [vmem:[#allocation5 + $0x110] ss:$8 sps:$4 sm:$0xff]   ;;  %v923_v4 = vld [vmem:[#allocation5 + $0x124] ss:$8 sps:$4 sm:$0xff]  }
  0x29   :  { %693 = vmatpush1.bf16.msra.mxu0 %v919_v1  ;;  %v925_v5 = vld [vmem:[#allocation5 + $0x120] ss:$8 sps:$4 sm:$0xff]   ;;  %v926_v6 = vld [vmem:[#allocation5 + $0x134] ss:$8 sps:$4 sm:$0xff]   ;;  %v928_v7 = vld [vmem:[#allocation5 + $0x130] ss:$8 sps:$4 sm:$0xff]  }
  0x2a   :  { %694 = vmatprep.subr.bf16.mxu0 %v920_v2  ;;  %v929_v8 = vld [vmem:[#allocation5 + $0x144] ss:$8 sps:$4 sm:$0xff]   ;;  %v931_v9 = vld [vmem:[#allocation5 + $0x140] ss:$8 sps:$4 sm:$0xff]   ;;  %v932_v10 = vld [vmem:[#allocation5 + $0x154] ss:$8 sps:$4 sm:$0xff]  }
  0x2b   :  { %v934_v11 = vld [vmem:[#allocation5 + $0x150] ss:$8 sps:$4 sm:$0xff]   ;;  %v935_v12 = vld [vmem:[#allocation5 + $0x164] ss:$8 sps:$4 sm:$0xff]   ;;  %v964_v14 = vld [vmem:[#allocation5] ss:$8 sps:$4 sm:$0xff]  }
  0x2c   :  { %v962_v13 = vld [vmem:[#allocation5 + $0x4] ss:$8 sps:$4 sm:$0xff]   ;;  %v937_v15 = vld [vmem:[#allocation5 + $0x160] ss:$8 sps:$4 sm:$0xff]   ;;  %v938_v16 = vld [vmem:[#allocation5 + $0x174] ss:$8 sps:$4 sm:$0xff]  }
  0x2d   :  { %695 = vmatpush1.bf16.msra.mxu0 %v922_v3  ;;  %649 = vmatprep.subr.bf16.mxu1 %v962_v13  ;;  %v968_v17 = vld [vmem:[#allocation5 + $0x14] ss:$8 sps:$4 sm:$0xff]   ;;  %v970_v18 = vld [vmem:[#allocation5 + $0x10] ss:$8 sps:$4 sm:$0xff]   ;;  %v52_v20 = vld [vmem:[#allocation2 + $0x48] sm:$0x1f] }
  0x2e   :  { %696 = vmatprep.subr.bf16.mxu0 %v923_v4  ;;  %650 = vmatpush1.bf16.msra.mxu1 %v964_v14  ;;  %v46_v19 = vld [vmem:[#allocation2 + $0x18] sm:$0xff]  ;;  %v974_v23 = vld [vmem:[#allocation5 + $0x24] ss:$8 sps:$4 sm:$0xff]   ;;  %v976_v24 = vld [vmem:[#allocation5 + $0x20] ss:$8 sps:$4 sm:$0xff]   ;;  %s1139_s13 = smov [#allocation7]  }
  0x2f   :  { %651 = vmatprep.subr.bf16.mxu1 %v968_v17  ;;  %v58_v21 = vpack.c.bf16 %v52_v20, %v46_v19  ;;  %v940_v22 = vld [vmem:[#allocation5 + $0x170] ss:$8 sps:$4 sm:$0xff]   ;;  %v941_v25 = vld [vmem:[#allocation5 + $0x184] ss:$8 sps:$4 sm:$0xff]   ;;  %v943_v26 = vld [vmem:[#allocation5 + $0x180] ss:$8 sps:$4 sm:$0xff]  }
  0x30   :  { %v980_v27 = vld [vmem:[#allocation5 + $0x34] ss:$8 sps:$4 sm:$0xff]   ;;  %v982_v29 = vld [vmem:[#allocation5 + $0x30] ss:$8 sps:$4 sm:$0xff]   ;;  %v986_v30 = vld [vmem:[#allocation5 + $0x44] ss:$8 sps:$4 sm:$0xff]  }
  0x31   :  { %697 = vmatpush1.bf16.msra.mxu0 %v925_v5  ;;  %724 = vmatprep.mubr.bf16.mxu0 %v58_v21  ;;  %v944_v28 = vld [vmem:[#allocation5 + $0x194] ss:$8 sps:$4 sm:$0xff]   ;;  %v946_v31 = vld [vmem:[#allocation5 + $0x190] ss:$8 sps:$4 sm:$0xff]   ;;  %v947_v32 = vld [vmem:[#allocation5 + $0x1a4] ss:$8 sps:$4 sm:$0xff]  }
  0x32   :  { %698 = vmatprep.subr.bf16.mxu0 %v926_v6  ;;  %652 = vmatpush1.bf16.msra.mxu1 %v970_v18  ;;  %v988_v33 = vld [vmem:[#allocation5 + $0x40] ss:$8 sps:$4 sm:$0xff]   ;;  %v992_v34 = vld [vmem:[#allocation5 + $0x54] ss:$8 sps:$4 sm:$0xff]   ;;  %v994_v37 = vld [vmem:[#allocation5 + $0x50] ss:$8 sps:$4 sm:$0xff]  }
  0x33   :  { %653 = vmatprep.subr.bf16.mxu1 %v974_v23  ;;  %v949_v35 = vld [vmem:[#allocation5 + $0x1a0] ss:$8 sps:$4 sm:$0xff]   ;;  %v950_v36 = vld [vmem:[#allocation5 + $0x1b4] ss:$8 sps:$4 sm:$0xff]   ;;  %v998_v38 = vld [vmem:[#allocation5 + $0x64] ss:$8 sps:$4 sm:$0xff]  }
  0x34   :  { %v952_v39 = vld [vmem:[#allocation5 + $0x1b0] ss:$8 sps:$4 sm:$0xff]   ;;  %v953_v40 = vld [vmem:[#allocation5 + $0x1c4] ss:$8 sps:$4 sm:$0xff]   ;;  %v1000_v41 = vld [vmem:[#allocation5 + $0x60] ss:$8 sps:$4 sm:$0xff]  }
  0x35   :  { %699 = vmatpush1.bf16.msra.mxu0 %v928_v7  ;;  %v1004_v42 = vld [vmem:[#allocation5 + $0x74] ss:$8 sps:$4 sm:$0xff]   ;;  %v955_v43 = vld [vmem:[#allocation5 + $0x1c0] ss:$8 sps:$4 sm:$0xff]   ;;  %v1006_v45 = vld [vmem:[#allocation5 + $0x70] ss:$8 sps:$4 sm:$0xff]  }
  0x36   :  { %700 = vmatprep.subr.bf16.mxu0 %v929_v8  ;;  %654 = vmatpush1.bf16.msra.mxu1 %v976_v24  ;;  %v956_v44 = vld [vmem:[#allocation5 + $0x1d4] ss:$8 sps:$4 sm:$0xff]   ;;  %v1010_v46 = vld [vmem:[#allocation5 + $0x84] ss:$8 sps:$4 sm:$0xff]   ;;  %v958_v47 = vld [vmem:[#allocation5 + $0x1d0] ss:$8 sps:$4 sm:$0xff]  }
  0x37   :  { %655 = vmatprep.subr.bf16.mxu1 %v980_v27  ;;  %v959_v48 = vld [vmem:[#allocation5 + $0x1e4] ss:$8 sps:$4 sm:$0xff]   ;;  %v1012_v49 = vld [vmem:[#allocation5 + $0x80] ss:$8 sps:$4 sm:$0xff]   ;;  %v1016_v50 = vld [vmem:[#allocation5 + $0x94] ss:$8 sps:$4 sm:$0xff]  }
  0x38   :  { %v961_v51 = vld [vmem:[#allocation5 + $0x1e0] ss:$8 sps:$4 sm:$0xff]   ;;  %v965_v52 = vld [vmem:[#allocation5 + $0x1f4] ss:$8 sps:$4 sm:$0xff]   ;;  %v1018_v53 = vld [vmem:[#allocation5 + $0x90] ss:$8 sps:$4 sm:$0xff]  }
  0x39   :  { %701 = vmatpush1.bf16.msra.mxu0 %v931_v9  ;;  %v1022_v54 = vld [vmem:[#allocation5 + $0xa4] ss:$8 sps:$4 sm:$0xff]   ;;  %v967_v55 = vld [vmem:[#allocation5 + $0x1f0] ss:$8 sps:$4 sm:$0xff]   ;;  %v1024_v59 = vld [vmem:[#allocation5 + $0xa0] ss:$8 sps:$4 sm:$0xff]  }
  0x3a   :  { %702 = vmatprep.subr.bf16.mxu0 %v932_v10  ;;  %656 = vmatpush1.bf16.msra.mxu1 %v982_v29  ;;  %v973_v56 = vld [vmem:[#allocation5 + $0x204] ss:$8 sps:$4 sm:$0xff]   ;;  %v45_v57 = vld [vmem:[#allocation2 + $0x10] sm:$0xff]  ;;  %v971_v61 = vld [vmem:[#allocation5 + $0x200] ss:$8 sps:$4 sm:$0xff]   ;;  %s787_s14 = sshll.u32 %s1139_s13, 4  ;;  %s788_s14 = int_to_ptr.vmem [resolvable:$true] %s787_s14 }
  0x3b   :  { %657 = vmatprep.subr.bf16.mxu1 %v986_v30  ;;  %v51_v58 = vld [vmem:[#allocation2 + $0x40] sm:$0x1f]  ;;  %v1028_v60 = vld [vmem:[#allocation5 + $0xb4] ss:$8 sps:$4 sm:$0xff]   ;;  %v1030_v0 = vld [vmem:[#allocation5 + $0xb0] ss:$8 sps:$4 sm:$0xff]   ;;  %p1110_p3 = scmp.lt.s32.totalorder %s788_s14, %s788_s14 }
  0x3c   :  { %v57_v62 = vpack.c.bf16 %v51_v58, %v45_v57  ;;  %v979_v63 = vld [vmem:[#allocation5 + $0x214] ss:$8 sps:$4 sm:$0xff]   ;;  %v1034_v1 = vld [vmem:[#allocation5 + $0xc4] ss:$8 sps:$4 sm:$0xff]   ;;  %v977_v6 = vld [vmem:[#allocation5 + $0x210] ss:$8 sps:$4 sm:$0xff]  }
  0x3d   :  { %703 = vmatpush1.bf16.msra.mxu0 %v934_v11  ;;  %v44_v2 = vld [vmem:[#allocation2 + $0x8] sm:$0xff]  ;;  %v50_v3 = vld [vmem:[#allocation2 + $0x38] sm:$0x1f]  ;;  %v49_v23 = vld [vmem:[#allocation2 + $0x30] sm:$0x1f] }
  0x3e   :  { %704 = vmatprep.subr.bf16.mxu0 %v935_v12  ;;  %658 = vmatpush1.bf16.msra.mxu1 %v988_v33  ;;  %v56_v4 = vpack.c.bf16 %v50_v3, %v44_v2  ;;  %v48_v5 = vld [vmem:[#allocation2 + $0x28] sm:$0xff]  ;;  %v54_v8 = vld [vmem:[#allocation2 + $0x58] sm:$0x1f]  ;;  %v157_v57 = vld [vmem:[%s1203_s2] sm:$0x3]  ;;  %s1105_s2 = scalar_lea.vmem %s788_s14, 512 }
  0x3f   :  { %659 = vmatprep.subr.bf16.mxu1 %v992_v34  ;;  %v1036_v7 = vld [vmem:[#allocation5 + $0xc0] ss:$8 sps:$4 sm:$0xff]   ;;  %v985_v9 = vld [vmem:[#allocation5 + $0x224] ss:$8 sps:$4 sm:$0xff]   ;;  %v1040_v10 = vld [vmem:[#allocation5 + $0xd4] ss:$8 sps:$4 sm:$0xff]   ;;  %v60_v11 = vpack.c.bf16 %v54_v8, %v48_v5  ;;  %p1106_p2 = scmp.ne.s32.totalorder %s788_s14, %s1105_s2  ;;  %p1111_p4 = scmp.lt.s32.totalorder %s1105_s2, %s1105_s2 }
  0x40   :  { %681 = vmatprep.mubr.bf16.mxu1 %v56_v4  ;;  %v983_v12 = vld [vmem:[#allocation5 + $0x220] ss:$8 sps:$4 sm:$0xff]   ;;  %v1042_v13 = vld [vmem:[#allocation5 + $0xd0] ss:$8 sps:$4 sm:$0xff]   ;;  %v991_v14 = vld [vmem:[#allocation5 + $0x234] ss:$8 sps:$4 sm:$0xff]  }
  0x41   :  { %705 = vmatpush1.bf16.msra.mxu0 %v937_v15  ;;  %v1046_v15 = vld [vmem:[#allocation5 + $0xe4] ss:$8 sps:$4 sm:$0xff]   ;;  %v1048_v17 = vld [vmem:[#allocation5 + $0xe0] ss:$8 sps:$4 sm:$0xff]   ;;  %v1052_v19 = vld [vmem:[#allocation5 + $0xf4] ss:$8 sps:$4 sm:$0xff]   ;;  %p1112_p5 = por %p1111_p4, %p1110_p3 }
  0x42   :  { %706 = vmatprep.subr.bf16.mxu0 %v938_v16  ;;  %660 = vmatpush1.bf16.msra.mxu1 %v994_v37  ;;  %v989_v16 = vld [vmem:[#allocation5 + $0x230] ss:$8 sps:$4 sm:$0xff]   ;;  %v997_v18 = vld [vmem:[#allocation5 + $0x244] ss:$8 sps:$4 sm:$0xff]   ;;  %v995_v20 = vld [vmem:[#allocation5 + $0x240] ss:$8 sps:$4 sm:$0xff]  }
  0x43   :  { %661 = vmatprep.subr.bf16.mxu1 %v998_v38  ;;  %v1054_v21 = vld [vmem:[#allocation5 + $0xf0] ss:$8 sps:$4 sm:$0xff]   ;;  %v1003_v24 = vld [vmem:[#allocation5 + $0x254] ss:$8 sps:$4 sm:$0xff]   ;;  %v1009_v27 = vld [vmem:[#allocation5 + $0x264] ss:$8 sps:$4 sm:$0xff]   ;;  %p1113_p6 = pnand %p1112_p5, %p1106_p2 }
  0x44   :  { %v1015_v29 = vld [vmem:[#allocation5 + $0x274] ss:$8 sps:$4 sm:$0xff]   ;;  %v1013_v30 = vld [vmem:[#allocation5 + $0x270] ss:$8 sps:$4 sm:$0xff]  }
  0x45   :  { %707 = vmatpush1.bf16.msra.mxu0 %v940_v22  ;;  %v43_v22 = vld [vmem:[#allocation2] sm:$0xff]  ;;  %v1027_v33 = vld [vmem:[#allocation5 + $0x294] ss:$8 sps:$4 sm:$0xff]   ;;  %v1025_v34 = vld [vmem:[#allocation5 + $0x290] ss:$8 sps:$4 sm:$0xff]  }
  0x46   :  { %708 = vmatprep.subr.bf16.mxu0 %v941_v25  ;;  %662 = vmatpush1.bf16.msra.mxu1 %v1000_v41  ;;  %v55_v25 = vpack.c.bf16 %v49_v23, %v43_v22  ;;  %v1039_v37 = vld [vmem:[#allocation5 + $0x2b4] ss:$8 sps:$4 sm:$0xff]   ;;  %v1037_v38 = vld [vmem:[#allocation5 + $0x2b0] ss:$8 sps:$4 sm:$0xff]  }
  0x47   :  { %663 = vmatprep.subr.bf16.mxu1 %v1004_v42  ;;  %v1051_v41 = vld [vmem:[#allocation5 + $0x2d4] ss:$8 sps:$4 sm:$0xff]   ;;  %v1049_v42 = vld [vmem:[#allocation5 + $0x2d0] ss:$8 sps:$4 sm:$0xff]  }
  0x49   :  { %709 = vmatpush1.bf16.msra.mxu0 %v943_v26  ;;  %v1001_v26 = vld [vmem:[#allocation5 + $0x250] ss:$8 sps:$4 sm:$0xff]  }
  0x4a   :  { %710 = vmatprep.subr.bf16.mxu0 %v944_v28  ;;  %664 = vmatpush1.bf16.msra.mxu1 %v1006_v45  ;;  %v1007_v28 = vld [vmem:[#allocation5 + $0x260] ss:$8 sps:$4 sm:$0xff]   ;;  %v1060_v45 = vld [vmem:[#allocation5 + $0x2f4] ss:$8 sps:$4 sm:$0xff]  }
  0x4b   :  { %665 = vmatprep.subr.bf16.mxu1 %v1010_v46  ;;  %v1058_v46 = vld [vmem:[#allocation5 + $0x2f0] ss:$8 sps:$4 sm:$0xff]  }
  0x4d   :  { %711 = vmatpush1.bf16.msra.mxu0 %v946_v31  ;;  %v1021_v31 = vld [vmem:[#allocation5 + $0x284] ss:$8 sps:$4 sm:$0xff]  }
  0x4e   :  { %712 = vmatprep.subr.bf16.mxu0 %v947_v32  ;;  %666 = vmatpush1.bf16.msra.mxu1 %v1012_v49  ;;  %v1019_v32 = vld [vmem:[#allocation5 + $0x280] ss:$8 sps:$4 sm:$0xff]  }
  0x4f   :  { %667 = vmatprep.subr.bf16.mxu1 %v1016_v50 }
  0x51   :  { %713 = vmatpush1.bf16.msra.mxu0 %v949_v35  ;;  %v1033_v35 = vld [vmem:[#allocation5 + $0x2a4] ss:$8 sps:$4 sm:$0xff]  }
  0x52   :  { %714 = vmatprep.subr.bf16.mxu0 %v950_v36  ;;  %668 = vmatpush1.bf16.msra.mxu1 %v1018_v53  ;;  %v1031_v36 = vld [vmem:[#allocation5 + $0x2a0] ss:$8 sps:$4 sm:$0xff]  }
  0x53   :  { %669 = vmatprep.subr.bf16.mxu1 %v1022_v54  ;;  %v159_v54 = vlaneseq }
  0x55   :  { %715 = vmatpush1.bf16.msra.mxu0 %v952_v39  ;;  %v1045_v39 = vld [vmem:[#allocation5 + $0x2c4] ss:$8 sps:$4 sm:$0xff]  }
  0x56   :  { %716 = vmatprep.subr.bf16.mxu0 %v953_v40  ;;  %670 = vmatpush1.bf16.msra.mxu1 %v1024_v59  ;;  %v1043_v40 = vld [vmem:[#allocation5 + $0x2c0] ss:$8 sps:$4 sm:$0xff]  }
  0x57   :  { %671 = vmatprep.subr.bf16.mxu1 %v1028_v60 }
  0x59   :  { %717 = vmatpush1.bf16.msra.mxu0 %v955_v43  ;;  %v1057_v43 = vld [vmem:[#allocation5 + $0x2e4] ss:$8 sps:$4 sm:$0xff]  }
  0x5a   :  { %718 = vmatprep.subr.bf16.mxu0 %v956_v44  ;;  %672 = vmatpush1.bf16.msra.mxu1 %v1030_v0  ;;  %v1055_v44 = vld [vmem:[#allocation5 + $0x2e0] ss:$8 sps:$4 sm:$0xff]  }
  0x5b   :  { %673 = vmatprep.subr.bf16.mxu1 %v1034_v1 }
  0x5d   :  { %719 = vmatpush1.bf16.msra.mxu0 %v958_v47  ;;  %v47_v47 = vld [vmem:[#allocation2 + $0x20] sm:$0xff] }
  0x5e   :  { %720 = vmatprep.subr.bf16.mxu0 %v959_v48  ;;  %674 = vmatpush1.bf16.msra.mxu1 %v1036_v7  ;;  %v53_v48 = vld [vmem:[#allocation2 + $0x50] sm:$0x1f] }
  0x5f   :  { %675 = vmatprep.subr.bf16.mxu1 %v1040_v10  ;;  %v59_v49 = vpack.c.bf16 %v53_v48, %v47_v47 }
  0x61   :  { %721 = vmatpush1.bf16.msra.mxu0 %v961_v51 }
  0x62   :  { %722 = vmatprep.subr.bf16.mxu0 %v965_v52  ;;  %676 = vmatpush1.bf16.msra.mxu1 %v1042_v13 }
  0x63   :  { %677 = vmatprep.subr.bf16.mxu1 %v1046_v15 }
  0x65   :  { %723 = vmatpush1.bf16.msra.mxu0 %v967_v55  ;;  %v160_v55 = vshrl.u32 %v159_v54, 7 }
  0x66   :  { %735 = vmatprep.subr.bf16.mxu0 %v973_v56  ;;  %678 = vmatpush1.bf16.msra.mxu1 %v1048_v17 }
  0x67   :  { %679 = vmatprep.subr.bf16.mxu1 %v1052_v19  ;;  %v161_v56 = vsub.s32 0, %v160_v55  ;;  %v165_v58 = vsub.s32 1, %v160_v55 }
  0x68   :  { %725 = vmatmul.mubr.bf16.vlgmr.msra.gmra.mrb[0].mxu0 %v57_v62 }
  0x69   :  { %736 = vmatpush1.bf16.msra.mxu0 %v971_v61  ;;  %767 = vmatprep.mubr.bf16.mxu0 %v60_v11  ;;  %v162_v59 = vrot.slane %v157_v57, %v161_v56  ;;  %v166_v60 = vrot.slane %v157_v57, %v165_v58 }
  0x6a   :  { %737 = vmatprep.subr.bf16.mxu0 %v979_v63  ;;  %680 = vmatpush1.bf16.msra.mxu1 %v1054_v21 }
  0x6d   :  { %738 = vmatpush1.bf16.msra.mxu0 %v977_v6  ;;  %682 = vmatmul.mubr.bf16.vlgmr.msra.gmra.mrb[0].mxu1 %v55_v25 }
  0x6e   :  { %739 = vmatprep.subr.bf16.mxu0 %v985_v9 }
  0x71   :  { %740 = vmatpush1.bf16.msra.mxu0 %v983_v12 }
  0x72   :  { %741 = vmatprep.subr.bf16.mxu0 %v991_v14 }
  0x75   :  { %742 = vmatpush1.bf16.msra.mxu0 %v989_v16 }
  0x76   :  { %743 = vmatprep.subr.bf16.mxu0 %v997_v18 }
  0x79   :  { %744 = vmatpush1.bf16.msra.mxu0 %v995_v20 }
  0x7a   :  { %745 = vmatprep.subr.bf16.mxu0 %v1003_v24 }
  0x7d   :  { %746 = vmatpush1.bf16.msra.mxu0 %v1001_v26 }
  0x7e   :  { %747 = vmatprep.subr.bf16.mxu0 %v1009_v27 }
  0x81   :  { %748 = vmatpush1.bf16.msra.mxu0 %v1007_v28 }
  0x82   :  { %749 = vmatprep.subr.bf16.mxu0 %v1015_v29 }
  0x85   :  { %750 = vmatpush1.bf16.msra.mxu0 %v1013_v30 }
  0x86   :  { %751 = vmatprep.subr.bf16.mxu0 %v1021_v31 }
  0x89   :  { %752 = vmatpush1.bf16.msra.mxu0 %v1019_v32 }
  0x8a   :  { %753 = vmatprep.subr.bf16.mxu0 %v1027_v33 }
  0x8d   :  { %754 = vmatpush1.bf16.msra.mxu0 %v1025_v34 }
  0x8e   :  { %755 = vmatprep.subr.bf16.mxu0 %v1033_v35 }
  0x91   :  { %756 = vmatpush1.bf16.msra.mxu0 %v1031_v36 }
  0x92   :  { %757 = vmatprep.subr.bf16.mxu0 %v1039_v37 }
  0x95   :  { %758 = vmatpush1.bf16.msra.mxu0 %v1037_v38 }
  0x96   :  { %759 = vmatprep.subr.bf16.mxu0 %v1045_v39 }
  0x99   :  { %760 = vmatpush1.bf16.msra.mxu0 %v1043_v40 }
  0x9a   :  { %761 = vmatprep.subr.bf16.mxu0 %v1051_v41 }
  0x9d   :  { %762 = vmatpush1.bf16.msra.mxu0 %v1049_v42 }
  0x9e   :  { %763 = vmatprep.subr.bf16.mxu0 %v1057_v43 }
  0xa1   :  { %764 = vmatpush1.bf16.msra.mxu0 %v1055_v44 }
  0xa2   :  { %765 = vmatprep.subr.bf16.mxu0 %v1060_v45 }
  0xa5   :  { %766 = vmatpush1.bf16.msra.mxu0 %v1058_v46 }
  0xa8   :  { %768 = vmatmul.mubr.bf16.vlgmr.msra.gmra.mrb[0].mxu0 %v59_v49 }
 0x140   :  { %v683_v50 = vpop.f32.mrb[0].mxu1 }
 0x141   :  { %v685_v51 = vpop.f32.mrb[1].mxu1  ;;  %v684_v61 = vadd.f32 %v683_v50, %v162_v59 }
 0x142   :  { %v687_v52 = vpop.f32.mrb[2].mxu1  ;;  %v686_v62 = vadd.f32 %v685_v51, %v166_v60 }
 0x143   :  { %v689_v53 = vpop.f32.mrb[3].mxu1  ;;  %v688_v0 = vadd.f32 %v687_v52, %v162_v59 }
 0x144   :  { %v690_v3 = vadd.f32 %v689_v53, %v166_v60 }
 0x17b   :  { %v769_v63 = vpop.f32.mrb[0].mxu0 }
 0x17c   :  { %v897_v1 = vadd.f32 %v769_v63, %v684_v61  ;;  %v771_v2 = vpop.f32.mrb[1].mxu0 }
 0x17d   :  { %v899_v4 = vadd.f32 %v771_v2, %v686_v62  ;;  %v773_v5 = vpop.f32.mrb[2].mxu0 }
 0x17e   :  { %778 = vst [vmem:[#allocation7] sm:$0xff] %v897_v1  ;;  %v901_v6 = vadd.f32 %v773_v5, %v688_v0  ;;  %v775_v7 = vpop.f32.mrb[3].mxu0 }
 0x17f   :  { %779 = vst [vmem:[#allocation7 + $0x8] sm:$0xff] %v899_v4  ;;  %v903_v8 = vadd.f32 %v775_v7, %v690_v3 }
 0x180   :  { %780 = vst [vmem:[#allocation7 + $0x10] sm:$0x1f] %v901_v6 }
 0x181   :  { %781 = vst [vmem:[#allocation7 + $0x18] sm:$0x1f] %v903_v8 }
 0x182   :  { %1116 = shalt.err (!%p1113_p6)
}
 0x183   :  { %s1117_s17 = scalar_lea.hbm %s1204_s3, 512 }
 0x184   :  { %p1118_p7 = scmp.ne.s32.totalorder %s1204_s3, %s1117_s17  ;;  %p1121_p8 = scmp.lt.u32.totalorder %s1117_s17, %s1204_s3 }
 0x186   :  { %p1123_p9 = pnand %p1121_p8, %p1118_p7 }
 0x188   :  { %1126 = shalt.err (!%p1123_p9)
}
 0x189   :  { %s1140_s22 = smov 256   ;;  %s1141_s23 = smov 16  }
 0x18a   :  { %793 = dma.vmem_to_hbm [thread:$0]  %s788_s14, 512, %s1204_s3, [#allocation4], %s1140_s22, %s1140_s22, %s1141_s23  }
 0x18b   :  { %1131 = dma.done.wait [#allocation4], 512  }
 0x18c   :  { %1132 = vsyncadd [#allocation4], 4294966784 }
 0x18d   :  { %797 = vsyncpa [#allocation3], 1 }
 0x18e   :  { %798 = vsyncpa [#allocation6], 1 }
 0x18f   :  { %799 = vsyncpa [#allocation4], 1 }

</bundles_post_ra>
